<compile_context>
chip_gen: v7x
topology: tpu7x:2x2x1
jax: 0.10.0
libtpu: 0.0.40
codegen_flags: <defaults>
</compile_context>

<pallas_src>
import jax
import jax.numpy as jnp
from jax.experimental import pallas as pl
from jax.experimental.pallas import tpu as pltpu


def _cdiv(a, b):
    return -(-a // b)


def _resident_spec(arr, single_buffer):
    """Full-array block + constant index map: stays resident in VMEM across the grid."""
    zeros = (0,) * arr.ndim
    index_map = lambda i, _z=zeros: _z
    if single_buffer:
        # Constant blocks are fetched once; one buffer is enough (halves their VMEM).
        return pl.BlockSpec(arr.shape, index_map, pipeline_mode=pl.Buffered(1))
    return pl.BlockSpec(arr.shape, index_map)


def _choose_tasks_per_block(batch, n_obs, target_rows, pooled_matmul):
    """Pick TB (tasks per grid block) and the number of grid blocks.

    Multi-block TBs are multiples of 8 (output-block sublane constraint); we aim
    for >= 2 (even) blocks whenever B >= 16 so the parallel grid axis can shard
    across the two TensorCores on v7x.  No host-side padding is needed: ragged
    last blocks rely on Pallas' OOB read/write semantics.
    """
    tb_cap = max(1, target_rows // max(n_obs, 1))
    if pooled_matmul:
        tb_cap = min(tb_cap, 64)   # keep the dense pooling matmul << one hidden layer
    if batch < 16:
        return batch, 1            # single full-array block (too small to split)
    tb_cap8 = max(8, (tb_cap // 8) * 8)
    nb = max(2, _cdiv(batch, tb_cap8))
    if nb % 2:
        nb += 1
    tb = _cdiv(_cdiv(batch, nb), 8) * 8
    return tb, _cdiv(batch, tb)


def _make_kernel(num_hidden, num_latents, inv_n, tb, n_obs, total_rows,
                 compute_dtype, use_reshape_mean):
    """Kernel body: `num_hidden` MLP layers + per-task mean + fused (mu|sigma) head."""

    def kernel(*refs):
        out_ref = refs[-1]
        if use_reshape_mean:
            xy_ref, params = refs[0], refs[1:-1]
            pool_ref = None
        else:
            (xy_ref, pool_ref), params = refs[:2], refs[2:-1]
        w_head_ref, b_head_ref = params[-2], params[-1]
        layer_refs = params[:-2]                       # [w0, b0, w1, b1, ...]

        # MLP over all (TB*N) rows: relu(h @ W + b), f32 accumulation on the MXU.
        act = xy_ref[...]                              # (TB*N, F), compute dtype
        h = act
        for li in range(num_hidden):
            w = layer_refs[2 * li][...]
            b = layer_refs[2 * li + 1][...]
            h = jnp.maximum(
                jnp.dot(act, w, preferred_element_type=jnp.float32) + b, 0.0)
            act = h.astype(compute_dtype)              # no-op in the f32 path

        # Per-task mean over the observation axis (exact f32 accumulation).
        if use_reshape_mean:
            # Layout no-op reshape (N % 8 == 0): sublane-group sum on the VPU/XLU,
            # free while the kernel is MXU-bound; 1/N applied in f32.
            h_mean = h.reshape(tb, n_obs, h.shape[-1]).sum(axis=1) * inv_n
        else:
            # Dense 1.0-entry pooling matmul.  Zero the rows past the real batch so
            # stale OOB values cannot leak into valid tasks through 0 * NaN.
            row = jax.lax.broadcasted_iota(jnp.int32, (h.shape[0], 1), 0)
            start = pl.program_id(0) * (tb * n_obs)
            h_valid = jnp.where(row + start < total_rows, h, 0.0)
            h_mean = jnp.dot(pool_ref[...], h_valid.astype(compute_dtype),
                             preferred_element_type=jnp.float32) * inv_n

        # Fused lane-dense head: [mu | sigma | zero padding] in one matmul.
        head = jnp.dot(h_mean.astype(compute_dtype), w_head_ref[...],
                       preferred_element_type=jnp.float32) + b_head_ref[...]
        lane = jax.lax.broadcasted_iota(jnp.int32, head.shape, 1)
        out = jnp.where(lane >= num_latents,
                        0.1 + 0.9 * jax.nn.sigmoid(head), head)
        out_ref[...] = out.astype(out_ref.dtype)

    return kernel


def stochastic_encoder_forward(context_x, context_y, params, *,
                               compute_dtype=jnp.float32, target_rows=None):
    """Pallas forward of Stochastic_Encoder.  Returns (mu, sigma).

    params: list of (W, b) pairs, W: (in, out), b: (out,).  The last two pairs are
    hidden_to_mu / hidden_to_sigma; everything before them is the hidden MLP.
    """
    B, N, xd = context_x.shape
    yd = context_y.shape[-1]
    F = xd + yd
    num_hidden = len(params) - 2
    L = params[-1][0].shape[1]
    total_rows = B * N

    # ---- generation-aware sizing ---------------------------------------------
    try:
        phys_vmem = int(pltpu.get_tpu_info().vmem_capacity_bytes)
    except Exception:                       # conservative default if query fails
        phys_vmem = 64 << 20
    if target_rows is None:
        # v5e/v6e (128 MiB VMEM): big blocks; v7x (64 MiB): smaller blocks + 2 TCs.
        target_rows = 4096 if phys_vmem >= (96 << 20) else 1024
    vmem_limit = (int(min(phys_vmem * 3 // 4, 96 << 20))
                  if phys_vmem >= (96 << 20) else None)

    use_reshape_mean = (N % 8 == 0)
    TB, num_blocks = _choose_tasks_per_block(
        B, N, target_rows, pooled_matmul=not use_reshape_mean)
    rows = TB * N
    # TODO(synk): a huge N with a tiny batch (one giant block) is not tiled along
    # the observation axis; typical NP context sizes fit comfortably in VMEM.

    # ---- pack inputs: one (B*N, xd+yd) operand (== torch.cat + view) -----------
    xy = jnp.concatenate([context_x, context_y], axis=-1)
    xy = xy.reshape(total_rows, F).astype(compute_dtype)

    # ---- parameter packing ------------------------------------------------------
    flat = []
    for w, b in params[:num_hidden]:
        flat.append(w.astype(compute_dtype))
        flat.append(b.reshape(1, -1).astype(jnp.float32))
    (w_mu, b_mu), (w_sig, b_sig) = params[-2], params[-1]
    H_last = w_mu.shape[0]
    out_cols = _cdiv(2 * L, 128) * 128                 # lane-dense output block
    w_head = jnp.zeros((H_last, out_cols), jnp.float32)
    w_head = w_head.at[:, :L].set(w_mu).at[:, L:2 * L].set(w_sig)
    b_head = jnp.zeros((1, out_cols), jnp.float32)
    b_head = b_head.at[0, :L].set(b_mu.reshape(-1)).at[0, L:2 * L].set(b_sig.reshape(-1))
    flat += [w_head.astype(compute_dtype), b_head]

    kernel = _make_kernel(num_hidden, L, 1.0 / N, TB, N, total_rows,
                          compute_dtype, use_reshape_mean)

    # ---- advisory cost estimate -------------------------------------------------
    dims = [F] + [w.shape[1] for w, _ in params[:num_hidden]]
    mlp_flops = 2 * total_rows * sum(dims[k] * dims[k + 1] for k in range(num_hidden))
    if use_reshape_mean:
        mean_flops = total_rows * dims[-1]
    else:
        mean_flops = 2 * num_blocks * TB * rows * dims[-1]
    head_flops = 2 * B * dims[-1] * out_cols
    in_bytes = int(xy.size) * xy.dtype.itemsize
    param_bytes = sum(int(a.size) * a.dtype.itemsize for a in flat)
    cost = pl.CostEstimate(
        flops=int(mlp_flops + mean_flops + head_flops),
        transcendentals=int(B * out_cols),
        bytes_accessed=int(in_bytes + param_bytes + B * out_cols * 4))

    cp_kwargs = dict(dimension_semantics=("parallel",))
    if vmem_limit is not None:
        cp_kwargs["vmem_limit_bytes"] = vmem_limit

    def _call(single_buffer_params):
        operands = [xy]
        in_specs = [pl.BlockSpec((rows, F), lambda i: (i, 0))]
        if not use_reshape_mean:
            pool = jnp.repeat(jnp.eye(TB, dtype=jnp.float32), N,
                              axis=1).astype(compute_dtype)
            operands.append(pool)
            in_specs.append(_resident_spec(pool, single_buffer_params))
        operands += flat
        in_specs += [_resident_spec(p, single_buffer_params) for p in flat]
        return pl.pallas_call(
            kernel,
            grid=(num_blocks,),
            in_specs=in_specs,
            out_specs=pl.BlockSpec((TB, out_cols), lambda i: (i, 0)),
            out_shape=jax.ShapeDtypeStruct((B, out_cols), jnp.float32),
            compiler_params=pltpu.CompilerParams(**cp_kwargs),
            cost_estimate=cost,
        )(*operands)

    try:
        out = _call(True)
    except Exception:   # pl.Buffered(1) unsupported on this jax -> default buffering
        out = _call(False)

    return out[:, :L], out[:, L:2 * L]


# ----------------------------------------------------------------------------- #
# Reference, parameter construction and self-test
# ----------------------------------------------------------------------------- #
def _init_linear(key, in_features, out_features):
    """Deterministic init mirroring nn.Linear's default U(-1/sqrt(in), 1/sqrt(in))."""
    kw, kb = jax.random.split(key)
    bound = 1.0 / jnp.sqrt(jnp.float32(in_features))
    w = jax.random.uniform(kw, (in_features, out_features), jnp.float32, -bound, bound)
    b = jax.random.uniform(kb, (out_features,), jnp.float32, -bound, bound)
    return w, b


def _make_params(key, input_dim, layer_sizes, num_latents):
    params = []
    prev = input_dim
    for h in layer_sizes:
        key, sub = jax.random.split(key)
        params.append(_init_linear(sub, prev, h))
        prev = h
    key, k_mu, k_sig = jax.random.split(key, 3)
    params.append(_init_linear(k_mu, prev, num_latents))    # hidden_to_mu
    params.append(_init_linear(k_sig, prev, num_latents))   # hidden_to_sigma
    return params


def _reference_forward(context_x, context_y, params):
    """Pure-JAX reference matching the PyTorch forward semantics."""
    x = jnp.concatenate([context_x, context_y], axis=-1).astype(jnp.float32)
    B, N, D = x.shape
    h = x.reshape(-1, D)
    num_hidden = len(params) - 2
    for i in range(num_hidden):
        w, b = params[i]
        h = jax.nn.relu(h @ w + b)
    h = h.reshape(B, N, -1).mean(axis=1)
    w_mu, b_mu = params[-2]
    w_sig, b_sig = params[-1]
    mu = h @ w_mu + b_mu
    sigma = 0.1 + 0.9 * jax.nn.sigmoid(h @ w_sig + b_sig)
    return mu, sigma


if __name__ == "__main__":
    x_dim, y_dim = 3, 1
    layer_sizes = [32, 32]
    num_latents = 16

    key = jax.random.PRNGKey(0)
    key, kp = jax.random.split(key)
    params = _make_params(kp, x_dim + y_dim, layer_sizes, num_latents)

    def check(batch, num_obs, compute_dtype, atol, rtol):
        kx, ky = jax.random.split(jax.random.fold_in(key, batch * 1000 + num_obs))
        cx = jax.random.normal(kx, (batch, num_obs, x_dim), jnp.float32)
        cy = jax.random.normal(ky, (batch, num_obs, y_dim), jnp.float32)
        mu, sigma = stochastic_encoder_forward(cx, cy, params,
                                               compute_dtype=compute_dtype)
        jax.block_until_ready((mu, sigma))
        mu_ref, sigma_ref = _reference_forward(cx, cy, params)
        assert mu.shape == (batch, num_latents), mu.shape
        assert sigma.shape == (batch, num_latents), sigma.shape
        assert bool(jnp.all(jnp.isfinite(mu))) and bool(jnp.all(jnp.isfinite(sigma)))
        assert jnp.allclose(mu, mu_ref, atol=atol, rtol=rtol), \
            float(jnp.max(jnp.abs(mu - mu_ref)))
        assert jnp.allclose(sigma, sigma_ref, atol=atol, rtol=rtol), \
            float(jnp.max(jnp.abs(sigma - sigma_ref)))

    # Canonical small shape (single block, reshape-mean path), exact f32 parity.
    check(batch=2, num_obs=8, compute_dtype=jnp.float32, atol=1e-5, rtol=1e-5)
    # Ragged multi-block path (B=20 -> 2 blocks of 16 tasks, last one ragged).
    check(batch=20, num_obs=8, compute_dtype=jnp.float32, atol=1e-5, rtol=1e-5)
    # N not a multiple of 8 -> pooling-matmul fallback path.
    check(batch=2, num_obs=5, compute_dtype=jnp.float32, atol=1e-5, rtol=1e-5)
    # bf16 matmul path (f32 accumulation); beneficial on v5e / v6e / v7x alike.
    check(batch=2, num_obs=8, compute_dtype=jnp.bfloat16, atol=1e-1, rtol=1e-1)

    # TODO(synk): torch.distributions.Normal has no Pallas equivalent; the kernel
    # returns the distribution's (mu, sigma) parameters instead.
    print("KERNEL_OK")
</pallas_src>

<mosaic_0001>
module attributes {stable_mosaic.version = 11 : i64} {
  func.func @kernel(%arg0: i32, %arg1: memref<16x4xf32, #tpu.memory_space<vmem>>, %arg2: memref<4x32xf32, #tpu.memory_space<vmem>>, %arg3: memref<1x32xf32, #tpu.memory_space<vmem>>, %arg4: memref<32x32xf32, #tpu.memory_space<vmem>>, %arg5: memref<1x32xf32, #tpu.memory_space<vmem>>, %arg6: memref<32x128xf32, #tpu.memory_space<vmem>>, %arg7: memref<1x128xf32, #tpu.memory_space<vmem>>, %arg8: memref<2x128xf32, #tpu.memory_space<vmem>>) attributes {dimension_semantics = [#tpu.dimension_semantics<parallel>], iteration_bounds = array<i64: 1>, scalar_prefetch = 0 : i64, scratch_operands = 0 : i64, tpu.core_type = #tpu.core_type<tc>, window_params = [{transform_indices = @transform_0, window_bounds = array<i64: 16, 4>}, {pipeline_mode = #tpu.pipeline_mode<synchronous>, transform_indices = @transform_1, window_bounds = array<i64: 4, 32>}, {pipeline_mode = #tpu.pipeline_mode<synchronous>, transform_indices = @transform_2, window_bounds = array<i64: 1, 32>}, {pipeline_mode = #tpu.pipeline_mode<synchronous>, transform_indices = @transform_3, window_bounds = array<i64: 32, 32>}, {pipeline_mode = #tpu.pipeline_mode<synchronous>, transform_indices = @transform_4, window_bounds = array<i64: 1, 32>}, {pipeline_mode = #tpu.pipeline_mode<synchronous>, transform_indices = @transform_5, window_bounds = array<i64: 32, 128>}, {pipeline_mode = #tpu.pipeline_mode<synchronous>, transform_indices = @transform_6, window_bounds = array<i64: 1, 128>}, {transform_indices = @transform_7, window_bounds = array<i64: 2, 128>}]} {
    %c0 = arith.constant 0 : index
    %c0_0 = arith.constant 0 : index
    %0 = vector.load %arg1[%c0, %c0_0] : memref<16x4xf32, #tpu.memory_space<vmem>>, vector<16x4xf32>
    %c0_1 = arith.constant 0 : index
    %c0_2 = arith.constant 0 : index
    %1 = vector.load %arg2[%c0_1, %c0_2] : memref<4x32xf32, #tpu.memory_space<vmem>>, vector<4x32xf32>
    %c0_3 = arith.constant 0 : index
    %c0_4 = arith.constant 0 : index
    %2 = vector.load %arg3[%c0_3, %c0_4] : memref<1x32xf32, #tpu.memory_space<vmem>>, vector<1x32xf32>
    %cst = arith.constant dense<0.000000e+00> : vector<16x32xf32>
    %3 = tpu.matmul %0, %1, %cst {dimension_numbers = #tpu.dot_dimension_numbers<[1], [0], [0], [1], [0, 0, 1, 1], [], []>} : vector<16x4xf32>, vector<4x32xf32>, vector<16x32xf32> -> vector<16x32xf32>
    %4 = vector.broadcast %2 : vector<1x32xf32> to vector<16x32xf32>
    %5 = arith.addf %3, %4 : vector<16x32xf32>
    %cst_5 = arith.constant 0.000000e+00 : f32
    %6 = vector.broadcast %cst_5 : f32 to vector<16x32xf32>
    %7 = arith.maximumf %5, %6 : vector<16x32xf32>
    %c0_6 = arith.constant 0 : index
    %c0_7 = arith.constant 0 : index
    %8 = vector.load %arg4[%c0_6, %c0_7] : memref<32x32xf32, #tpu.memory_space<vmem>>, vector<32x32xf32>
    %c0_8 = arith.constant 0 : index
    %c0_9 = arith.constant 0 : index
    %9 = vector.load %arg5[%c0_8, %c0_9] : memref<1x32xf32, #tpu.memory_space<vmem>>, vector<1x32xf32>
    %cst_10 = arith.constant dense<0.000000e+00> : vector<16x32xf32>
    %10 = tpu.matmul %7, %8, %cst_10 {dimension_numbers = #tpu.dot_dimension_numbers<[1], [0], [0], [1], [0, 0, 1, 1], [], []>} : vector<16x32xf32>, vector<32x32xf32>, vector<16x32xf32> -> vector<16x32xf32>
    %11 = vector.broadcast %9 : vector<1x32xf32> to vector<16x32xf32>
    %12 = arith.addf %10, %11 : vector<16x32xf32>
    %cst_11 = arith.constant 0.000000e+00 : f32
    %13 = vector.broadcast %cst_11 : f32 to vector<16x32xf32>
    %14 = arith.maximumf %12, %13 : vector<16x32xf32>
    %15 = vector.shape_cast %14 : vector<16x32xf32> to vector<2x8x32xf32>
    %cst_12 = arith.constant dense<0.000000e+00> : vector<2x32xf32>
    %16 = vector.multi_reduction <add>, %15, %cst_12 [1] : vector<2x8x32xf32> to vector<2x32xf32>
    %cst_13 = arith.constant 1.250000e-01 : f32
    %17 = vector.broadcast %cst_13 : f32 to vector<2x32xf32>
    %18 = arith.mulf %16, %17 : vector<2x32xf32>
    %c0_14 = arith.constant 0 : index
    %c0_15 = arith.constant 0 : index
    %19 = vector.load %arg6[%c0_14, %c0_15] : memref<32x128xf32, #tpu.memory_space<vmem>>, vector<32x128xf32>
    %cst_16 = arith.constant dense<0.000000e+00> : vector<2x128xf32>
    %20 = tpu.matmul %18, %19, %cst_16 {dimension_numbers = #tpu.dot_dimension_numbers<[1], [0], [0], [1], [0, 0, 1, 1], [], []>} : vector<2x32xf32>, vector<32x128xf32>, vector<2x128xf32> -> vector<2x128xf32>
    %c0_17 = arith.constant 0 : index
    %c0_18 = arith.constant 0 : index
    %21 = vector.load %arg7[%c0_17, %c0_18] : memref<1x128xf32, #tpu.memory_space<vmem>>, vector<1x128xf32>
    %22 = vector.broadcast %21 : vector<1x128xf32> to vector<2x128xf32>
    %23 = arith.addf %20, %22 : vector<2x128xf32>
    %24 = tpu.iota {dimensions = array<i32: 1>} : vector<2x128xi32>
    %c16_i32 = arith.constant 16 : i32
    %25 = vector.broadcast %c16_i32 : i32 to vector<2x128xi32>
    %26 = arith.cmpi sge, %24, %25 : vector<2x128xi32>
    %27 = arith.negf %23 : vector<2x128xf32>
    %28 = math.exp %27 : vector<2x128xf32>
    %cst_19 = arith.constant 1.000000e+00 : f32
    %29 = vector.broadcast %cst_19 : f32 to vector<2x128xf32>
    %30 = arith.addf %29, %28 : vector<2x128xf32>
    %31 = arith.divf %29, %30 : vector<2x128xf32>
    %cst_20 = arith.constant 0.899999976 : f32
    %32 = vector.broadcast %cst_20 : f32 to vector<2x128xf32>
    %33 = arith.mulf %32, %31 : vector<2x128xf32>
    %cst_21 = arith.constant 1.000000e-01 : f32
    %34 = vector.broadcast %cst_21 : f32 to vector<2x128xf32>
    %35 = arith.addf %34, %33 : vector<2x128xf32>
    %36 = arith.select %26, %35, %23 : vector<2x128xi1>, vector<2x128xf32>
    %c0_22 = arith.constant 0 : index
    %c0_23 = arith.constant 0 : index
    %37 = vector.load %arg8[%c0_22, %c0_23] : memref<2x128xf32, #tpu.memory_space<vmem>>, vector<2x128xf32>
    tpu.vector_store %arg8[%c0_22, %c0_23], %36 {strides = array<i32>} : memref<2x128xf32, #tpu.memory_space<vmem>>, vector<2x128xf32>,
    return
  }
  func.func @transform_0(%arg0: i32) -> (i32, i32) {
    %c0_i32 = arith.constant 0 : i32
    %c0_i32_0 = arith.constant 0 : i32
    return %arg0, %c0_i32 : i32, i32
  }
  func.func @transform_1(%arg0: i32) -> (i32, i32) {
    %c0_i32 = arith.constant 0 : i32
    %c0_i32_0 = arith.constant 0 : i32
    %c0_i32_1 = arith.constant 0 : i32
    return %c0_i32, %c0_i32_0 : i32, i32
  }
  func.func @transform_2(%arg0: i32) -> (i32, i32) {
    %c0_i32 = arith.constant 0 : i32
    %c0_i32_0 = arith.constant 0 : i32
    %c0_i32_1 = arith.constant 0 : i32
    return %c0_i32, %c0_i32_0 : i32, i32
  }
  func.func @transform_3(%arg0: i32) -> (i32, i32) {
    %c0_i32 = arith.constant 0 : i32
    %c0_i32_0 = arith.constant 0 : i32
    %c0_i32_1 = arith.constant 0 : i32
    return %c0_i32, %c0_i32_0 : i32, i32
  }
  func.func @transform_4(%arg0: i32) -> (i32, i32) {
    %c0_i32 = arith.constant 0 : i32
    %c0_i32_0 = arith.constant 0 : i32
    %c0_i32_1 = arith.constant 0 : i32
    return %c0_i32, %c0_i32_0 : i32, i32
  }
  func.func @transform_5(%arg0: i32) -> (i32, i32) {
    %c0_i32 = arith.constant 0 : i32
    %c0_i32_0 = arith.constant 0 : i32
    %c0_i32_1 = arith.constant 0 : i32
    return %c0_i32, %c0_i32_0 : i32, i32
  }
  func.func @transform_6(%arg0: i32) -> (i32, i32) {
    %c0_i32 = arith.constant 0 : i32
    %c0_i32_0 = arith.constant 0 : i32
    %c0_i32_1 = arith.constant 0 : i32
    return %c0_i32, %c0_i32_0 : i32, i32
  }
  func.func @transform_7(%arg0: i32) -> (i32, i32) {
    %c0_i32 = arith.constant 0 : i32
    %c0_i32_0 = arith.constant 0 : i32
    return %arg0, %c0_i32 : i32, i32
  }
}

module attributes {stable_mosaic.version = 11 : i64} {
  func.func @kernel(%arg0: i32, %arg1: memref<16x4xf32, #tpu.memory_space<vmem>>, %arg2: memref<4x32xf32, #tpu.memory_space<vmem>>, %arg3: memref<1x32xf32, #tpu.memory_space<vmem>>, %arg4: memref<32x32xf32, #tpu.memory_space<vmem>>, %arg5: memref<1x32xf32, #tpu.memory_space<vmem>>, %arg6: memref<32x128xf32, #tpu.memory_space<vmem>>, %arg7: memref<1x128xf32, #tpu.memory_space<vmem>>, %arg8: memref<2x128xf32, #tpu.memory_space<vmem>>) attributes {dimension_semantics = [#tpu.dimension_semantics<parallel>], iteration_bounds = array<i64: 1>, scalar_prefetch = 0 : i64, scratch_operands = 0 : i64, tpu.core_type = #tpu.core_type<tc>, window_params = [{transform_indices = @transform_0, window_bounds = array<i64: 16, 4>}, {pipeline_mode = #tpu.pipeline_mode<synchronous>, transform_indices = @transform_1, window_bounds = array<i64: 4, 32>}, {pipeline_mode = #tpu.pipeline_mode<synchronous>, transform_indices = @transform_2, window_bounds = array<i64: 1, 32>}, {pipeline_mode = #tpu.pipeline_mode<synchronous>, transform_indices = @transform_3, window_bounds = array<i64: 32, 32>}, {pipeline_mode = #tpu.pipeline_mode<synchronous>, transform_indices = @transform_4, window_bounds = array<i64: 1, 32>}, {pipeline_mode = #tpu.pipeline_mode<synchronous>, transform_indices = @transform_5, window_bounds = array<i64: 32, 128>}, {pipeline_mode = #tpu.pipeline_mode<synchronous>, transform_indices = @transform_6, window_bounds = array<i64: 1, 128>}, {transform_indices = @transform_7, window_bounds = array<i64: 2, 128>}]} {
    %c0 = arith.constant 0 : index
    %c0_0 = arith.constant 0 : index
    %0 = vector.load %arg1[%c0, %c0_0] : memref<16x4xf32, #tpu.memory_space<vmem>>, vector<16x4xf32>
    %c0_1 = arith.constant 0 : index
    %c0_2 = arith.constant 0 : index
    %1 = vector.load %arg2[%c0_1, %c0_2] : memref<4x32xf32, #tpu.memory_space<vmem>>, vector<4x32xf32>
    %c0_3 = arith.constant 0 : index
    %c0_4 = arith.constant 0 : index
    %2 = vector.load %arg3[%c0_3, %c0_4] : memref<1x32xf32, #tpu.memory_space<vmem>>, vector<1x32xf32>
    %cst = arith.constant dense<0.000000e+00> : vector<16x32xf32>
    %3 = tpu.matmul %0, %1, %cst {dimension_numbers = #tpu.dot_dimension_numbers<[1], [0], [0], [1], [0, 0, 1, 1], [], []>} : vector<16x4xf32>, vector<4x32xf32>, vector<16x32xf32> -> vector<16x32xf32>
    %4 = vector.broadcast %2 : vector<1x32xf32> to vector<16x32xf32>
    %5 = arith.addf %3, %4 : vector<16x32xf32>
    %cst_5 = arith.constant 0.000000e+00 : f32
    %6 = vector.broadcast %cst_5 : f32 to vector<16x32xf32>
    %7 = arith.maximumf %5, %6 : vector<16x32xf32>
    %c0_6 = arith.constant 0 : index
    %c0_7 = arith.constant 0 : index
    %8 = vector.load %arg4[%c0_6, %c0_7] : memref<32x32xf32, #tpu.memory_space<vmem>>, vector<32x32xf32>
    %c0_8 = arith.constant 0 : index
    %c0_9 = arith.constant 0 : index
    %9 = vector.load %arg5[%c0_8, %c0_9] : memref<1x32xf32, #tpu.memory_space<vmem>>, vector<1x32xf32>
    %cst_10 = arith.constant dense<0.000000e+00> : vector<16x32xf32>
    %10 = tpu.matmul %7, %8, %cst_10 {dimension_numbers = #tpu.dot_dimension_numbers<[1], [0], [0], [1], [0, 0, 1, 1], [], []>} : vector<16x32xf32>, vector<32x32xf32>, vector<16x32xf32> -> vector<16x32xf32>
    %11 = vector.broadcast %9 : vector<1x32xf32> to vector<16x32xf32>
    %12 = arith.addf %10, %11 : vector<16x32xf32>
    %cst_11 = arith.constant 0.000000e+00 : f32
    %13 = vector.broadcast %cst_11 : f32 to vector<16x32xf32>
    %14 = arith.maximumf %12, %13 : vector<16x32xf32>
    %15 = vector.shape_cast %14 : vector<16x32xf32> to vector<2x8x32xf32>
    %cst_12 = arith.constant dense<0.000000e+00> : vector<2x32xf32>
    %16 = vector.multi_reduction <add>, %15, %cst_12 [1] : vector<2x8x32xf32> to vector<2x32xf32>
    %cst_13 = arith.constant 1.250000e-01 : f32
    %17 = vector.broadcast %cst_13 : f32 to vector<2x32xf32>
    %18 = arith.mulf %16, %17 : vector<2x32xf32>
    %c0_14 = arith.constant 0 : index
    %c0_15 = arith.constant 0 : index
    %19 = vector.load %arg6[%c0_14, %c0_15] : memref<32x128xf32, #tpu.memory_space<vmem>>, vector<32x128xf32>
    %cst_16 = arith.constant dense<0.000000e+00> : vector<2x128xf32>
    %20 = tpu.matmul %18, %19, %cst_16 {dimension_numbers = #tpu.dot_dimension_numbers<[1], [0], [0], [1], [0, 0, 1, 1], [], []>} : vector<2x32xf32>, vector<32x128xf32>, vector<2x128xf32> -> vector<2x128xf32>
    %c0_17 = arith.constant 0 : index
    %c0_18 = arith.constant 0 : index
    %21 = vector.load %arg7[%c0_17, %c0_18] : memref<1x128xf32, #tpu.memory_space<vmem>>, vector<1x128xf32>
    %22 = vector.broadcast %21 : vector<1x128xf32> to vector<2x128xf32>
    %23 = arith.addf %20, %22 : vector<2x128xf32>
    %24 = tpu.iota {dimensions = array<i32: 1>} : vector<2x128xi32>
    %c16_i32 = arith.constant 16 : i32
    %25 = vector.broadcast %c16_i32 : i32 to vector<2x128xi32>
    %26 = arith.cmpi sge, %24, %25 : vector<2x128xi32>
    %27 = arith.negf %23 : vector<2x128xf32>
    %28 = math.exp %27 : vector<2x128xf32>
    %cst_19 = arith.constant 1.000000e+00 : f32
    %29 = vector.broadcast %cst_19 : f32 to vector<2x128xf32>
    %30 = arith.addf %29, %28 : vector<2x128xf32>
    %31 = arith.divf %29, %30 : vector<2x128xf32>
    %cst_20 = arith.constant 0.899999976 : f32
    %32 = vector.broadcast %cst_20 : f32 to vector<2x128xf32>
    %33 = arith.mulf %32, %31 : vector<2x128xf32>
    %cst_21 = arith.constant 1.000000e-01 : f32
    %34 = vector.broadcast %cst_21 : f32 to vector<2x128xf32>
    %35 = arith.addf %34, %33 : vector<2x128xf32>
    %36 = arith.select %26, %35, %23 : vector<2x128xi1>, vector<2x128xf32>
    %c0_22 = arith.constant 0 : index
    %c0_23 = arith.constant 0 : index
    %37 = vector.load %arg8[%c0_22, %c0_23] : memref<2x128xf32, #tpu.memory_space<vmem>>, vector<2x128xf32>
    tpu.vector_store %arg8[%c0_22, %c0_23], %36 {strides = array<i32>} : memref<2x128xf32, #tpu.memory_space<vmem>>, vector<2x128xf32>,
    return
  }
  func.func @transform_0(%arg0: i32) -> (i32, i32) {
    %c0_i32 = arith.constant 0 : i32
    %c0_i32_0 = arith.constant 0 : i32
    return %arg0, %c0_i32 : i32, i32
  }
  func.func @transform_1(%arg0: i32) -> (i32, i32) {
    %c0_i32 = arith.constant 0 : i32
    %c0_i32_0 = arith.constant 0 : i32
    %c0_i32_1 = arith.constant 0 : i32
    return %c0_i32, %c0_i32_0 : i32, i32
  }
  func.func @transform_2(%arg0: i32) -> (i32, i32) {
    %c0_i32 = arith.constant 0 : i32
    %c0_i32_0 = arith.constant 0 : i32
    %c0_i32_1 = arith.constant 0 : i32
    return %c0_i32, %c0_i32_0 : i32, i32
  }
  func.func @transform_3(%arg0: i32) -> (i32, i32) {
    %c0_i32 = arith.constant 0 : i32
    %c0_i32_0 = arith.constant 0 : i32
    %c0_i32_1 = arith.constant 0 : i32
    return %c0_i32, %c0_i32_0 : i32, i32
  }
  func.func @transform_4(%arg0: i32) -> (i32, i32) {
    %c0_i32 = arith.constant 0 : i32
    %c0_i32_0 = arith.constant 0 : i32
    %c0_i32_1 = arith.constant 0 : i32
    return %c0_i32, %c0_i32_0 : i32, i32
  }
  func.func @transform_5(%arg0: i32) -> (i32, i32) {
    %c0_i32 = arith.constant 0 : i32
    %c0_i32_0 = arith.constant 0 : i32
    %c0_i32_1 = arith.constant 0 : i32
    return %c0_i32, %c0_i32_0 : i32, i32
  }
  func.func @transform_6(%arg0: i32) -> (i32, i32) {
    %c0_i32 = arith.constant 0 : i32
    %c0_i32_0 = arith.constant 0 : i32
    %c0_i32_1 = arith.constant 0 : i32
    return %c0_i32, %c0_i32_0 : i32, i32
  }
  func.func @transform_7(%arg0: i32) -> (i32, i32) {
    %c0_i32 = arith.constant 0 : i32
    %c0_i32_0 = arith.constant 0 : i32
    return %arg0, %c0_i32 : i32, i32
  }
}

</mosaic_0001>

<bundles_post_ra>
// kernel: tpu_custom_call.1
= control target key start
LH: loop header
LB: loop body
LE: loop exit
PB: predicated region body
PF: predicated region fallthrough
CT: control target
= control target key end

     0   :  { %12 = vsyncpa [#allocation3], 0  ;;  %s595_s0 = inlined_call_operand.vmem [shape: f32[16,4], index: 0, kind: input, shape index: {}]   ;;  %s596_s1 = inlined_call_operand.vmem [shape: f32[4,32], index: 1, kind: input, shape index: {}]   ;;  %s597_s2 = inlined_call_operand.vmem [shape: f32[1,32], index: 2, kind: input, shape index: {}]   ;;  %s598_s3 = inlined_call_operand.hbm [shape: f32[32,32], index: 3, kind: input, shape index: {}]   ;;  %s599_s4 = inlined_call_operand.vmem [shape: f32[1,32], index: 4, kind: input, shape index: {}]   ;;  %s600_s5 = inlined_call_operand.vmem [shape: f32[32,128], index: 5, kind: input, shape index: {}]   ;;  %s601_s6 = inlined_call_operand.vmem [shape: f32[1,128], index: 6, kind: input, shape index: {}]   ;;  %s602_s7 = inlined_call_operand.hbm [shape: f32[2,128], index: 7, kind: output, shape index: {}]  }
   0x1   :  { %13 = vsyncpa [#allocation4], 0  ;;  %s489_s24 = smov [#allocation2]   ;;  %s441_s28 = scalar_lea.hbm %s598_s3, 512 }
   0x2   :  { %s25_s25 = sshll.u32 %s489_s24, 4  ;;  %p442_p0 = scmp.ne.s32.totalorder %s598_s3, %s441_s28  ;;  %s26_s25 = int_to_ptr.vmem [resolvable:$true] %s25_s25 }
   0x3   :  { %p445_p1 = scmp.lt.u32.totalorder %s441_s28, %s598_s3 }
   0x5   :  { %p447_p2 = pnand %p445_p1, %p442_p0 }
   0x7   :  { %450 = shalt.err (!%p447_p2)
}
   0x8   :  { %s451_s10 = scalar_lea.vmem %s26_s25, 512  ;;  %p456_p4 = scmp.lt.s32.totalorder %s26_s25, %s26_s25 }
   0x9   :  { %p452_p3 = scmp.ne.s32.totalorder %s26_s25, %s451_s10  ;;  %p457_p5 = scmp.lt.s32.totalorder %s451_s10, %s451_s10 }
   0xb   :  { %p458_p6 = por %p457_p5, %p456_p4 }
   0xd   :  { %p459_p7 = pnand %p458_p6, %p452_p3 }
   0xf   :  { %462 = shalt.err (!%p459_p7)
}
  0x10   :  { %s490_s11 = smov 128   ;;  %s491_s12 = smov 8  }
  0x11   :  { %31 = dma.hbm_to_vmem [thread:$0]  %s598_s3, 512, %s26_s25, [#allocation3], %s490_s11, %s490_s11, %s491_s12  }
  0x12   :  { %485 = dma.done.wait [#allocation3], 512  }
  0x13   :  { %486 = vsyncadd [#allocation3], 4294966784  ;;  %vm58_vm0 = vcmask 1043456   ;;  %vm51_vm1 = vcmask 31744   ;;  %v43_v0 = vld [vmem:[%s596_s1] sm:$0xf]  ;;  %v337_v55 = vlaneseq }
  0x14   :  { %v41_v1 = vld [vmem:[%s595_s0] sm:$0xff]  ;;  %v42_v2 = vld [vmem:[%s595_s0 + $0x8] sm:$0xff]  ;;  %389 = vmatprep.subr.msk.mxu0 %vm58_vm0, %v43_v0  ;;  %v141_v6 = vld [vmem:[#allocation2 + $0x10] sm:$0xff]  ;;  %vm150_vm2 = vcmask 261120   ;;  %v492_v19 = vmov 0.0|0.0   ;;  %vm493_vm3 = vmmov 0  }
  0x15   :  { %391 = vmatprep.mubr.msk.f32.mxu0 %vm51_vm1, %v41_v1  ;;  %v139_v3 = vld [vmem:[#allocation2] sm:$0xff]  ;;  %v140_v4 = vld [vmem:[#allocation2 + $0x8] sm:$0xff]  ;;  %390 = vmatpush3.msk.msra.mxu0 %vm58_vm0, %v43_v0  ;;  %v142_v7 = vld [vmem:[#allocation2 + $0x18] sm:$0xff]  ;;  %v494_v23 = vmov 0.0   ;;  %vm263_vm4 = vcmask 1041409   ;;  %v338_v56 = vand.u32 127, %v337_v55 }
  0x16   :  { %v416_v5 = vpack.c.bf16 %v140_v4, %v139_v3  ;;  %392 = vmatmul.mubr.msk.f32.vlgmr.msra.gmra.mrb[0].mxu0 %vm51_vm1, %v42_v2  ;;  %v420_v8 = vpack.c.bf16 %v142_v7, %v141_v6  ;;  %v365_v9 = vld [vmem:[%s597_s2] ss:$0 sm:$0xff]  ;;  %v251_v17 = vld [vmem:[%s600_s5 + $0x8] sm:$0xff]  ;;  %424 = vmatprep.subr.bf16.mxu0 %v492_v19  ;;  %v252_v20 = vld [vmem:[%s600_s5 + $0x10] sm:$0xff]  ;;  %s495_s29 = smov [#allocation5]  }
  0x17   :  { %v250_v16 = vld [vmem:[%s600_s5] sm:$0xff]  ;;  %v253_v21 = vld [vmem:[%s600_s5 + $0x18] sm:$0xff]  ;;  %413 = vmatprep.mubr.msk.f32.mxu0 %vm493_vm3, %v494_v23  ;;  %s356_s30 = sshll.u32 %s495_s29, 4  ;;  %vm339_vm5 = vcmp.ge.s32.totalorder %v338_v56, 16  ;;  %s357_s30 = int_to_ptr.vmem [resolvable:$true] %s356_s30 }
  0x18   :  { %417 = vmatprep.subr.bf16.mxu1 %v416_v5  ;;  %v425_v18 = vpack.c.bf16 %v251_v17, %v250_v16  ;;  %v428_v22 = vpack.c.bf16 %v253_v21, %v252_v20  ;;  %v369_v24 = vld [vmem:[%s599_s4] ss:$0 sm:$0xff]  ;;  %p468_p9 = scmp.lt.s32.totalorder %s357_s30, %s357_s30 }
  0x19   :  { %419 = vmatpush3.bf16.msra.mxu1 %v416_v5  ;;  %v372_v48 = vld [vmem:[%s601_s6] ss:$0 sm:$0xff]  ;;  %s463_s6 = scalar_lea.vmem %s357_s30, 32 }
  0x1a   :  { %421 = vmatprep.subr.bf16.mxu1 %v420_v8  ;;  %426 = vmatpush3.bf16.msra.mxu0 %v425_v18  ;;  %p464_p8 = scmp.ne.s32.totalorder %s357_s30, %s463_s6  ;;  %p469_p10 = scmp.lt.s32.totalorder %s463_s6, %s463_s6 }
  0x1b   :  { %427 = vmatprep.subr.bf16.mxu0 %v492_v19 }
  0x1c   :  { %p470_p11 = por %p469_p10, %p468_p9 }
  0x1d   :  { %423 = vmatpush3.bf16.msra.mxu1 %v420_v8 }
  0x1e   :  { %429 = vmatpush3.bf16.msra.mxu0 %v428_v22  ;;  %p471_p12 = pnand %p470_p11, %p464_p8 }
  0xe9   :  { %v393_v10 = vpop.f32.mrb[0].mxu0 }
  0xea   :  { %v134_v11 = vadd.f32 %v393_v10, %v365_v9  ;;  %v128_v12 = vpop.f32.mrb[1].mxu0 }
  0xeb   :  { %v129_v13 = vadd.f32 %v365_v9, %v128_v12 }
  0xec   :  { %v138_v15 = vmax.f32 %v134_v11, 0.0 }
  0xed   :  { %v137_v14 = vmax.f32 %v129_v13, 0.0 }
  0xef   :  { %402 = vmatprep.mubr.msk.f32.mxu1 %vm150_vm2, %v137_v14 }
  0xf0   :  { %403 = vmatmul.mubr.msk.f32.vlgmr.msra.gmra.mrb[0].mxu1 %vm150_vm2, %v138_v15 }
 0x1c3   :  { %v404_v25 = vpop.f32.mrb[0].mxu1 }
 0x1c4   :  { %v229_v26 = vadd.f32 %v404_v25, %v369_v24  ;;  %v223_v27 = vpop.f32.mrb[1].mxu1 }
 0x1c5   :  { %v224_v28 = vadd.f32 %v369_v24, %v223_v27 }
 0x1c6   :  { %v233_v29 = vmax.f32 %v229_v26, 0.0 }
 0x1c7   :  { %v232_v30 = vmax.f32 %v224_v28, 0.0 }
 0x1c8   :  { %v241_v31 = vsel %vm150_vm2, %v233_v29, 0.0 }
 0x1c9   :  { %v242_v32 = vrot.slane %v241_v31, 4  ;;  %v234_v33 = vsel %vm150_vm2, %v232_v30, 0.0 }
 0x1ca   :  { %v235_v34 = vrot.slane %v234_v33, 4 }
 0x1cb   :  { %v243_v35 = vadd.f32 %v242_v32, %v241_v31 }
 0x1cc   :  { %v236_v36 = vadd.f32 %v235_v34, %v234_v33 }
 0x1cd   :  { %v244_v37 = vrot.slane %v243_v35, 2 }
 0x1ce   :  { %v237_v38 = vrot.slane %v236_v36, 2 }
 0x1cf   :  { %v245_v39 = vadd.f32 %v244_v37, %v243_v35 }
 0x1d0   :  { %v238_v40 = vadd.f32 %v237_v38, %v236_v36 }
 0x1d1   :  { %v246_v41 = vrot.slane %v245_v39, 1 }
 0x1d2   :  { %v239_v42 = vrot.slane %v238_v40, 1 }
 0x1d3   :  { %v247_v43 = vadd.f32 %v246_v41, %v245_v39 }
 0x1d4   :  { %v240_v44 = vadd.f32 %v239_v42, %v238_v40 }
 0x1d5   :  { %v249_v45 = vmul.f32 0.125, %v247_v43 }
 0x1d6   :  { %v248_v46 = vmul.f32 0.125, %v240_v44 }
 0x1d8   :  { %v264_v47 = vsel %vm263_vm4, %v249_v45, %v248_v46 }
 0x1d9   :  { %414 = vmatmul.mubr.msk.f32.vlgmr.msra.gmra.mrb[2].mxu0 %vm150_vm2, %v264_v47 }
 0x2ac   :  { %v333_v49 = vpop.f32.mrb[2].mxu0 }
 0x2ad   :  { %v334_v50 = vadd.f32 %v372_v48, %v333_v49  ;;  %v415_v51 = vpop.f32.mrb[3].mxu0 }
 0x2af   :  { %v374_v52 = vmul.f32 -1.442695, %v334_v50 }
 0x2b1   :  { %437 = vpow2.f32 %v374_v52 }
 0x2bb   :  { %v438_v53 = vpop.eup %437 }
 0x2bc   :  { %v343_v54 = vadd.f32 1.0, %v438_v53 }
 0x2be   :  { %439 = vrcp.f32 %v343_v54 }
 0x2c8   :  { %v440_v57 = vpop.eup %439 }
 0x2c9   :  { %v346_v58 = vmul.f32 0.9, %v440_v57 }
 0x2cb   :  { %v347_v59 = vadd.f32 0.1, %v346_v58 }
 0x2cd   :  { %v348_v60 = vsel %vm339_vm5, %v347_v59, %v334_v50 }
 0x2ce   :  { %349 = vst [vmem:[#allocation5] sm:$0x3] %v348_v60 }
 0x2cf   :  { %474 = shalt.err (!%p471_p12)
}
 0x2d0   :  { %s475_s10 = scalar_lea.hbm %s602_s7, 32 }
 0x2d1   :  { %p476_p13 = scmp.ne.s32.totalorder %s602_s7, %s475_s10  ;;  %p479_p0 = scmp.lt.u32.totalorder %s475_s10, %s602_s7 }
 0x2d3   :  { %p481_p1 = pnand %p479_p0, %p476_p13 }
 0x2d5   :  { %484 = shalt.err (!%p481_p1)
}
 0x2d6   :  { %359 = dma.vmem_to_hbm [thread:$0]  %s357_s30, 32, %s602_s7, [#allocation4]  }
 0x2d7   :  { %487 = dma.done.wait [#allocation4], 32  }
 0x2d8   :  { %488 = vsyncadd [#allocation4], 4294967264 }
 0x2d9   :  { %363 = vsyncpa [#allocation3], 1 }
 0x2da   :  { %364 = vsyncpa [#allocation4], 1 }

// kernel: tpu_custom_call.1
= control target key start
LH: loop header
LB: loop body
LE: loop exit
PB: predicated region body
PF: predicated region fallthrough
CT: control target
= control target key end

     0   :  { %12 = vsyncpa [#allocation3], 0  ;;  %s595_s0 = inlined_call_operand.vmem [shape: f32[16,4], index: 0, kind: input, shape index: {}]   ;;  %s596_s1 = inlined_call_operand.vmem [shape: f32[4,32], index: 1, kind: input, shape index: {}]   ;;  %s597_s2 = inlined_call_operand.vmem [shape: f32[1,32], index: 2, kind: input, shape index: {}]   ;;  %s598_s3 = inlined_call_operand.hbm [shape: f32[32,32], index: 3, kind: input, shape index: {}]   ;;  %s599_s4 = inlined_call_operand.vmem [shape: f32[1,32], index: 4, kind: input, shape index: {}]   ;;  %s600_s5 = inlined_call_operand.vmem [shape: f32[32,128], index: 5, kind: input, shape index: {}]   ;;  %s601_s6 = inlined_call_operand.vmem [shape: f32[1,128], index: 6, kind: input, shape index: {}]   ;;  %s602_s7 = inlined_call_operand.hbm [shape: f32[2,128], index: 7, kind: output, shape index: {}]  }
   0x1   :  { %13 = vsyncpa [#allocation4], 0  ;;  %s489_s24 = smov [#allocation2]   ;;  %s441_s28 = scalar_lea.hbm %s598_s3, 512 }
   0x2   :  { %s25_s25 = sshll.u32 %s489_s24, 4  ;;  %p442_p0 = scmp.ne.s32.totalorder %s598_s3, %s441_s28  ;;  %s26_s25 = int_to_ptr.vmem [resolvable:$true] %s25_s25 }
   0x3   :  { %p445_p1 = scmp.lt.u32.totalorder %s441_s28, %s598_s3 }
   0x5   :  { %p447_p2 = pnand %p445_p1, %p442_p0 }
   0x7   :  { %450 = shalt.err (!%p447_p2)
}
   0x8   :  { %s451_s10 = scalar_lea.vmem %s26_s25, 512  ;;  %p456_p4 = scmp.lt.s32.totalorder %s26_s25, %s26_s25 }
   0x9   :  { %p452_p3 = scmp.ne.s32.totalorder %s26_s25, %s451_s10  ;;  %p457_p5 = scmp.lt.s32.totalorder %s451_s10, %s451_s10 }
   0xb   :  { %p458_p6 = por %p457_p5, %p456_p4 }
   0xd   :  { %p459_p7 = pnand %p458_p6, %p452_p3 }
   0xf   :  { %462 = shalt.err (!%p459_p7)
}
  0x10   :  { %s490_s11 = smov 128   ;;  %s491_s12 = smov 8  }
  0x11   :  { %31 = dma.hbm_to_vmem [thread:$0]  %s598_s3, 512, %s26_s25, [#allocation3], %s490_s11, %s490_s11, %s491_s12  }
  0x12   :  { %485 = dma.done.wait [#allocation3], 512  }
  0x13   :  { %486 = vsyncadd [#allocation3], 4294966784  ;;  %vm58_vm0 = vcmask 1043456   ;;  %vm51_vm1 = vcmask 31744   ;;  %v43_v0 = vld [vmem:[%s596_s1] sm:$0xf]  ;;  %v337_v55 = vlaneseq }
  0x14   :  { %v41_v1 = vld [vmem:[%s595_s0] sm:$0xff]  ;;  %v42_v2 = vld [vmem:[%s595_s0 + $0x8] sm:$0xff]  ;;  %389 = vmatprep.subr.msk.mxu0 %vm58_vm0, %v43_v0  ;;  %v141_v6 = vld [vmem:[#allocation2 + $0x10] sm:$0xff]  ;;  %vm150_vm2 = vcmask 261120   ;;  %v492_v19 = vmov 0.0|0.0   ;;  %vm493_vm3 = vmmov 0  }
  0x15   :  { %391 = vmatprep.mubr.msk.f32.mxu0 %vm51_vm1, %v41_v1  ;;  %v139_v3 = vld [vmem:[#allocation2] sm:$0xff]  ;;  %v140_v4 = vld [vmem:[#allocation2 + $0x8] sm:$0xff]  ;;  %390 = vmatpush3.msk.msra.mxu0 %vm58_vm0, %v43_v0  ;;  %v142_v7 = vld [vmem:[#allocation2 + $0x18] sm:$0xff]  ;;  %v494_v23 = vmov 0.0   ;;  %vm263_vm4 = vcmask 1041409   ;;  %v338_v56 = vand.u32 127, %v337_v55 }
  0x16   :  { %v416_v5 = vpack.c.bf16 %v140_v4, %v139_v3  ;;  %392 = vmatmul.mubr.msk.f32.vlgmr.msra.gmra.mrb[0].mxu0 %vm51_vm1, %v42_v2  ;;  %v420_v8 = vpack.c.bf16 %v142_v7, %v141_v6  ;;  %v365_v9 = vld [vmem:[%s597_s2] ss:$0 sm:$0xff]  ;;  %v251_v17 = vld [vmem:[%s600_s5 + $0x8] sm:$0xff]  ;;  %424 = vmatprep.subr.bf16.mxu0 %v492_v19  ;;  %v252_v20 = vld [vmem:[%s600_s5 + $0x10] sm:$0xff]  ;;  %s495_s29 = smov [#allocation5]  }
  0x17   :  { %v250_v16 = vld [vmem:[%s600_s5] sm:$0xff]  ;;  %v253_v21 = vld [vmem:[%s600_s5 + $0x18] sm:$0xff]  ;;  %413 = vmatprep.mubr.msk.f32.mxu0 %vm493_vm3, %v494_v23  ;;  %s356_s30 = sshll.u32 %s495_s29, 4  ;;  %vm339_vm5 = vcmp.ge.s32.totalorder %v338_v56, 16  ;;  %s357_s30 = int_to_ptr.vmem [resolvable:$true] %s356_s30 }
  0x18   :  { %417 = vmatprep.subr.bf16.mxu1 %v416_v5  ;;  %v425_v18 = vpack.c.bf16 %v251_v17, %v250_v16  ;;  %v428_v22 = vpack.c.bf16 %v253_v21, %v252_v20  ;;  %v369_v24 = vld [vmem:[%s599_s4] ss:$0 sm:$0xff]  ;;  %p468_p9 = scmp.lt.s32.totalorder %s357_s30, %s357_s30 }
  0x19   :  { %419 = vmatpush3.bf16.msra.mxu1 %v416_v5  ;;  %v372_v48 = vld [vmem:[%s601_s6] ss:$0 sm:$0xff]  ;;  %s463_s6 = scalar_lea.vmem %s357_s30, 32 }
  0x1a   :  { %421 = vmatprep.subr.bf16.mxu1 %v420_v8  ;;  %426 = vmatpush3.bf16.msra.mxu0 %v425_v18  ;;  %p464_p8 = scmp.ne.s32.totalorder %s357_s30, %s463_s6  ;;  %p469_p10 = scmp.lt.s32.totalorder %s463_s6, %s463_s6 }
  0x1b   :  { %427 = vmatprep.subr.bf16.mxu0 %v492_v19 }
  0x1c   :  { %p470_p11 = por %p469_p10, %p468_p9 }
  0x1d   :  { %423 = vmatpush3.bf16.msra.mxu1 %v420_v8 }
  0x1e   :  { %429 = vmatpush3.bf16.msra.mxu0 %v428_v22  ;;  %p471_p12 = pnand %p470_p11, %p464_p8 }
  0xe9   :  { %v393_v10 = vpop.f32.mrb[0].mxu0 }
  0xea   :  { %v134_v11 = vadd.f32 %v393_v10, %v365_v9  ;;  %v128_v12 = vpop.f32.mrb[1].mxu0 }
  0xeb   :  { %v129_v13 = vadd.f32 %v365_v9, %v128_v12 }
  0xec   :  { %v138_v15 = vmax.f32 %v134_v11, 0.0 }
  0xed   :  { %v137_v14 = vmax.f32 %v129_v13, 0.0 }
  0xef   :  { %402 = vmatprep.mubr.msk.f32.mxu1 %vm150_vm2, %v137_v14 }
  0xf0   :  { %403 = vmatmul.mubr.msk.f32.vlgmr.msra.gmra.mrb[0].mxu1 %vm150_vm2, %v138_v15 }
 0x1c3   :  { %v404_v25 = vpop.f32.mrb[0].mxu1 }
 0x1c4   :  { %v229_v26 = vadd.f32 %v404_v25, %v369_v24  ;;  %v223_v27 = vpop.f32.mrb[1].mxu1 }
 0x1c5   :  { %v224_v28 = vadd.f32 %v369_v24, %v223_v27 }
 0x1c6   :  { %v233_v29 = vmax.f32 %v229_v26, 0.0 }
 0x1c7   :  { %v232_v30 = vmax.f32 %v224_v28, 0.0 }
 0x1c8   :  { %v241_v31 = vsel %vm150_vm2, %v233_v29, 0.0 }
 0x1c9   :  { %v242_v32 = vrot.slane %v241_v31, 4  ;;  %v234_v33 = vsel %vm150_vm2, %v232_v30, 0.0 }
 0x1ca   :  { %v235_v34 = vrot.slane %v234_v33, 4 }
 0x1cb   :  { %v243_v35 = vadd.f32 %v242_v32, %v241_v31 }
 0x1cc   :  { %v236_v36 = vadd.f32 %v235_v34, %v234_v33 }
 0x1cd   :  { %v244_v37 = vrot.slane %v243_v35, 2 }
 0x1ce   :  { %v237_v38 = vrot.slane %v236_v36, 2 }
 0x1cf   :  { %v245_v39 = vadd.f32 %v244_v37, %v243_v35 }
 0x1d0   :  { %v238_v40 = vadd.f32 %v237_v38, %v236_v36 }
 0x1d1   :  { %v246_v41 = vrot.slane %v245_v39, 1 }
 0x1d2   :  { %v239_v42 = vrot.slane %v238_v40, 1 }
 0x1d3   :  { %v247_v43 = vadd.f32 %v246_v41, %v245_v39 }
 0x1d4   :  { %v240_v44 = vadd.f32 %v239_v42, %v238_v40 }
 0x1d5   :  { %v249_v45 = vmul.f32 0.125, %v247_v43 }
 0x1d6   :  { %v248_v46 = vmul.f32 0.125, %v240_v44 }
 0x1d8   :  { %v264_v47 = vsel %vm263_vm4, %v249_v45, %v248_v46 }
 0x1d9   :  { %414 = vmatmul.mubr.msk.f32.vlgmr.msra.gmra.mrb[2].mxu0 %vm150_vm2, %v264_v47 }
 0x2ac   :  { %v333_v49 = vpop.f32.mrb[2].mxu0 }
 0x2ad   :  { %v334_v50 = vadd.f32 %v372_v48, %v333_v49  ;;  %v415_v51 = vpop.f32.mrb[3].mxu0 }
 0x2af   :  { %v374_v52 = vmul.f32 -1.442695, %v334_v50 }
 0x2b1   :  { %437 = vpow2.f32 %v374_v52 }
 0x2bb   :  { %v438_v53 = vpop.eup %437 }
 0x2bc   :  { %v343_v54 = vadd.f32 1.0, %v438_v53 }
 0x2be   :  { %439 = vrcp.f32 %v343_v54 }
 0x2c8   :  { %v440_v57 = vpop.eup %439 }
 0x2c9   :  { %v346_v58 = vmul.f32 0.9, %v440_v57 }
 0x2cb   :  { %v347_v59 = vadd.f32 0.1, %v346_v58 }
 0x2cd   :  { %v348_v60 = vsel %vm339_vm5, %v347_v59, %v334_v50 }
 0x2ce   :  { %349 = vst [vmem:[#allocation5] sm:$0x3] %v348_v60 }
 0x2cf   :  { %474 = shalt.err (!%p471_p12)
}
 0x2d0   :  { %s475_s10 = scalar_lea.hbm %s602_s7, 32 }
 0x2d1   :  { %p476_p13 = scmp.ne.s32.totalorder %s602_s7, %s475_s10  ;;  %p479_p0 = scmp.lt.u32.totalorder %s475_s10, %s602_s7 }
 0x2d3   :  { %p481_p1 = pnand %p479_p0, %p476_p13 }
 0x2d5   :  { %484 = shalt.err (!%p481_p1)
}
 0x2d6   :  { %359 = dma.vmem_to_hbm [thread:$0]  %s357_s30, 32, %s602_s7, [#allocation4]  }
 0x2d7   :  { %487 = dma.done.wait [#allocation4], 32  }
 0x2d8   :  { %488 = vsyncadd [#allocation4], 4294967264 }
 0x2d9   :  { %363 = vsyncpa [#allocation3], 1 }
 0x2da   :  { %364 = vsyncpa [#allocation4], 1 }

</bundles_post_ra>
